<compile_context>
chip_gen: v7x
topology: tpu7x:2x2x1
jax: 0.10.0
libtpu: 0.0.40
codegen_flags: <defaults>
</compile_context>

<pallas_src>
import numpy as np
import jax
import jax.numpy as jnp
from jax.experimental import pallas as pl
from jax.experimental.pallas import tpu as pltpu


def tupleize_marginals(marginal_indices):
    """Minimal re-implementation of swyft.utils.tupleize_marginals for the
    depth-2 case used here (list of lists of ints)."""
    return tuple(tuple(int(i) for i in mi) for mi in marginal_indices)


def get_marginal_block_shape(marginal_indices):
    mi = tupleize_marginals(marginal_indices)
    assert all(len(mi[0]) == len(m) for m in mi), "ragged marginal indices"
    return len(mi), len(mi[0])


def _sublane_multiple(dtype) -> int:
    """Sublane packing multiple for the given dtype (8 f32, 16 bf16, 32 int8)."""
    itemsize = jnp.dtype(dtype).itemsize
    return max(8, 32 // itemsize)


def _choose_batch_tile(B: int, row_bytes: int, sublane: int,
                       target_step_bytes: int = 4 << 20,
                       vmem_budget_bytes: int = 12 << 20) -> int:
    """Pick the batch tile by bytes-per-step.

    Each grid step should move roughly `target_step_bytes` of HBM traffic so
    the ~0.35 us per-step overhead is amortized (small tiles measure at
    30-60% of HBM roofline, MiB-scale tiles at ~85%+), while the
    double-buffered VMEM footprint (2 * TB * row_bytes) stays under
    `vmem_budget_bytes`, which fits the default scoped VMEM limit on every
    generation (v5e 16 MiB, v6e/v7x 32 MiB, v7x physical 64 MiB).

    No '>= 2 grid steps' forcing: on single-TC chips (v5e/v6e) extra steps
    only add overhead, and large batches naturally produce several steps.
    When there already are multiple steps, the count is nudged to an even
    number so the 'parallel' axis splits evenly across v7x's two TCs.
    """
    def round_dn(x): return max(sublane, (x // sublane) * sublane)
    def round_up(x): return ((x + sublane - 1) // sublane) * sublane
    def cdiv(a, b): return -(-a // b)

    tb_target = round_dn(target_step_bytes // row_bytes)
    tb_vmem = round_dn(vmem_budget_bytes // (2 * row_bytes))  # 2x double-buffer
    tb = min(tb_target, tb_vmem)

    b_padded = round_up(B)
    tb = min(tb, b_padded)

    steps = cdiv(b_padded, tb)
    if steps > 1 and steps % 2 == 1:
        # Even step count -> balanced megacore split on v7x.
        tb = round_up(cdiv(b_padded, steps + 1))
    return tb


def make_combinator_kernel(marginal_indices, head_features):
    """Kernel: broadcast features across marginals and copy the parameter
    lanes per marginal, writing each segment with a static-slice store into a
    lane-dense flat (TB, M*(F+K)) output row."""
    mi_tuples = tupleize_marginals(marginal_indices)
    F = head_features
    K = len(mi_tuples[0])

    def _param_block(p_ref, mi, out_dtype):
        k = len(mi)
        # Contiguous run -> single static lane slice (no cross-lane shuffles).
        if all(mi[j] == mi[0] + j for j in range(k)):
            return p_ref[:, mi[0]:mi[0] + k]
        # Non-contiguous tuple: trace-time one-hot (P, K) selection matrix;
        # the lane permutation rides the otherwise-idle MXU slot instead of
        # K 1-lane slices + concat (cross-lane XLU/VALU work).
        P = p_ref.shape[1]
        sel = np.zeros((P, k), dtype=np.float32)
        for j, c in enumerate(mi):
            sel[c, j] = 1.0
        g = jnp.dot(p_ref[...].astype(jnp.float32), jnp.asarray(sel),
                    preferred_element_type=jnp.float32)
        return g.astype(out_dtype)

    def kernel(f_ref, p_ref, o_ref):
        # f_ref: (TB, F)   p_ref: (TB, P)   o_ref: (TB, M*(F+K)) flat, lane-dense
        fb = f_ref[...]  # read features once, reused for every marginal
        # Static unroll is fine for small M; per-segment static-slice stores
        # avoid assembling the interleaved W-wide row in registers (no XLU
        # rotates / (TB, W) temporary, short vreg live ranges).
        for j, mi in enumerate(mi_tuples):
            off = j * (F + K)
            o_ref[:, off:off + F] = fb
            o_ref[:, off + F:off + F + K] = _param_block(p_ref, mi, o_ref.dtype)

    return kernel


def combinator_forward(features, parameters, marginal_indices):
    """Pallas wrapper reproducing Combinator.forward."""
    B, F = features.shape
    P = parameters.shape[1]
    M, K = get_marginal_block_shape(marginal_indices)
    W = M * (F + K)  # flat, lane-dense output width
    dtype = features.dtype
    itemsize = jnp.dtype(dtype).itemsize

    row_bytes = (F + P + W) * itemsize            # HBM traffic per batch row
    TB = _choose_batch_tile(B, row_bytes, _sublane_multiple(dtype))

    steps = pl.cdiv(B, TB)
    B_pad = steps * TB
    if B_pad != B:
        # Pad so awkward / large batch sizes still pipeline (and can split
        # across v7x's two TensorCores); padded rows are dropped below.
        features = jnp.pad(features, ((0, B_pad - B), (0, 0)))
        parameters = jnp.pad(parameters, ((0, B_pad - B), (0, 0)))

    kernel = make_combinator_kernel(marginal_indices, F)

    flat = pl.pallas_call(
        kernel,
        out_shape=jax.ShapeDtypeStruct((B_pad, W), dtype),
        grid=(steps,),
        in_specs=[
            pl.BlockSpec((TB, F), lambda i: (i, 0)),
            pl.BlockSpec((TB, P), lambda i: (i, 0)),
        ],
        out_specs=pl.BlockSpec((TB, W), lambda i: (i, 0)),
        compiler_params=pltpu.CompilerParams(
            dimension_semantics=("parallel",),
        ),
        cost_estimate=pl.CostEstimate(
            flops=0,
            transcendentals=0,
            bytes_accessed=int(B_pad) * int(row_bytes),
        ),
    )(features, parameters)

    # Drop batch padding; row-major reshape back to (B, M, F+K) is free.
    return flat[:B].reshape(B, M, F + K)


def combinator_reference(features, parameters, marginal_indices):
    """Pure-JAX reference mirroring the torch code."""
    mi = tupleize_marginals(marginal_indices)
    M = len(mi)
    mb = jnp.stack([parameters[..., jnp.array(m)] for m in mi], axis=1)  # (B, M, K)
    fb = jnp.broadcast_to(features[:, None, :],
                          (features.shape[0], M, features.shape[1]))     # (B, M, F)
    return jnp.concatenate([fb, mb], axis=2)


if __name__ == "__main__":
    # Module configuration (deterministic, in-script)
    head_features = 32
    marginal_indices = [[0, 1], [1, 2], [2, 3]]  # n_marginals=3, n_parameters=2

    # Small deterministic example inputs.
    B = 128
    n_param_total = 4
    key = jax.random.PRNGKey(0)
    kf, kp = jax.random.split(key)
    features = jax.random.normal(kf, (B, head_features), dtype=jnp.float32)
    parameters = jax.random.normal(kp, (B, n_param_total), dtype=jnp.float32)

    out = combinator_forward(features, parameters, marginal_indices)
    out = jax.block_until_ready(out)

    ref = combinator_reference(features, parameters, marginal_indices)
    assert out.shape == (B, len(marginal_indices),
                         head_features + len(marginal_indices[0]))
    assert jnp.array_equal(out, ref), "mismatch vs reference"

    print("KERNEL_OK")
</pallas_src>

<mosaic_0001>
module attributes {stable_mosaic.version = 11 : i64} {
  func.func @kernel(%arg0: i32, %arg1: memref<128x32xf32, #tpu.memory_space<vmem>>, %arg2: memref<128x4xf32, #tpu.memory_space<vmem>>, %arg3: memref<128x102xf32, #tpu.memory_space<vmem>>) attributes {dimension_semantics = [#tpu.dimension_semantics<parallel>], iteration_bounds = array<i64: 1>, scalar_prefetch = 0 : i64, scratch_operands = 0 : i64, tpu.core_type = #tpu.core_type<tc>, window_params = [{transform_indices = @transform_0, window_bounds = array<i64: 128, 32>}, {transform_indices = @transform_1, window_bounds = array<i64: 128, 4>}, {transform_indices = @transform_2, window_bounds = array<i64: 128, 102>}]} {
    %c0 = arith.constant 0 : index
    %c0_0 = arith.constant 0 : index
    %0 = vector.load %arg1[%c0, %c0_0] : memref<128x32xf32, #tpu.memory_space<vmem>>, vector<128x32xf32>
    %c0_1 = arith.constant 0 : index
    %c0_2 = arith.constant 0 : index
    %1 = vector.load %arg3[%c0_1, %c0_2] : memref<128x102xf32, #tpu.memory_space<vmem>>, vector<128x32xf32>
    tpu.vector_store %arg3[%c0_1, %c0_2], %0 {strides = array<i32>} : memref<128x102xf32, #tpu.memory_space<vmem>>, vector<128x32xf32>,
    %c0_3 = arith.constant 0 : index
    %c0_4 = arith.constant 0 : index
    %2 = vector.load %arg2[%c0_3, %c0_4] : memref<128x4xf32, #tpu.memory_space<vmem>>, vector<128x2xf32>
    %c0_5 = arith.constant 0 : index
    %c32 = arith.constant 32 : index
    %3 = vector.load %arg3[%c0_5, %c32] : memref<128x102xf32, #tpu.memory_space<vmem>>, vector<128x2xf32>
    tpu.vector_store %arg3[%c0_5, %c32], %2 {strides = array<i32>} : memref<128x102xf32, #tpu.memory_space<vmem>>, vector<128x2xf32>,
    %c0_6 = arith.constant 0 : index
    %c34 = arith.constant 34 : index
    %4 = vector.load %arg3[%c0_6, %c34] : memref<128x102xf32, #tpu.memory_space<vmem>>, vector<128x32xf32>
    tpu.vector_store %arg3[%c0_6, %c34], %0 {strides = array<i32>} : memref<128x102xf32, #tpu.memory_space<vmem>>, vector<128x32xf32>,
    %c0_7 = arith.constant 0 : index
    %c1 = arith.constant 1 : index
    %5 = vector.load %arg2[%c0_7, %c1] : memref<128x4xf32, #tpu.memory_space<vmem>>, vector<128x2xf32>
    %c0_8 = arith.constant 0 : index
    %c66 = arith.constant 66 : index
    %6 = vector.load %arg3[%c0_8, %c66] : memref<128x102xf32, #tpu.memory_space<vmem>>, vector<128x2xf32>
    tpu.vector_store %arg3[%c0_8, %c66], %5 {strides = array<i32>} : memref<128x102xf32, #tpu.memory_space<vmem>>, vector<128x2xf32>,
    %c0_9 = arith.constant 0 : index
    %c68 = arith.constant 68 : index
    %7 = vector.load %arg3[%c0_9, %c68] : memref<128x102xf32, #tpu.memory_space<vmem>>, vector<128x32xf32>
    tpu.vector_store %arg3[%c0_9, %c68], %0 {strides = array<i32>} : memref<128x102xf32, #tpu.memory_space<vmem>>, vector<128x32xf32>,
    %c0_10 = arith.constant 0 : index
    %c2 = arith.constant 2 : index
    %8 = vector.load %arg2[%c0_10, %c2] : memref<128x4xf32, #tpu.memory_space<vmem>>, vector<128x2xf32>
    %c0_11 = arith.constant 0 : index
    %c100 = arith.constant 100 : index
    %9 = vector.load %arg3[%c0_11, %c100] : memref<128x102xf32, #tpu.memory_space<vmem>>, vector<128x2xf32>
    tpu.vector_store %arg3[%c0_11, %c100], %8 {strides = array<i32>} : memref<128x102xf32, #tpu.memory_space<vmem>>, vector<128x2xf32>,
    return
  }
  func.func @transform_0(%arg0: i32) -> (i32, i32) {
    %c0_i32 = arith.constant 0 : i32
    %c0_i32_0 = arith.constant 0 : i32
    return %arg0, %c0_i32 : i32, i32
  }
  func.func @transform_1(%arg0: i32) -> (i32, i32) {
    %c0_i32 = arith.constant 0 : i32
    %c0_i32_0 = arith.constant 0 : i32
    return %arg0, %c0_i32 : i32, i32
  }
  func.func @transform_2(%arg0: i32) -> (i32, i32) {
    %c0_i32 = arith.constant 0 : i32
    %c0_i32_0 = arith.constant 0 : i32
    return %arg0, %c0_i32 : i32, i32
  }
}

</mosaic_0001>

<bundles_post_ra>
// kernel: tpu_custom_call.1
= control target key start
LH: loop header
LB: loop body
LE: loop exit
PB: predicated region body
PF: predicated region fallthrough
CT: control target
= control target key end

     0   :  { %s490_s13 = smov 32   ;;  %vm27_vm0 = vcmask 261120   ;;  %s491_s24 = smov 34   ;;  %vm124_vm1 = vcmask 277760   ;;  %vm205_vm2 = vcmask 539920   ;;  %vm302_vm3 = vcmask 556560   ;;  %s1182_s1 = inlined_call_operand.vmem [shape: f32[128,4], index: 1, kind: input, shape index: {}]   ;;  %s1183_s0 = inlined_call_operand.vmem [shape: f32[128,32], index: 0, kind: input, shape index: {}]   ;;  %s1184_s2 = inlined_call_operand.vmem [shape: f32[128,102], index: 2, kind: output, shape index: {}]  }
   0x1   :  { %v513_v0 = vld [vmem:[%s1182_s1 + $0x10] sm:$0xff]  ;;  %v518_v1 = vld [vmem:[%s1182_s1] sm:$0xff]  ;;  %v527_v2 = vld [vmem:[%s1182_s1 + $0x18] sm:$0xff]  ;;  %s494_s12 = smov 98   ;;  %vm367_vm4 = vcmask 818720   ;;  %vm464_vm5 = vcmask 835360  }
   0x2   :  { %80 = vrot.lane.b32.xlu1 %v513_v0, %s490_s13  ;;  %76 = vrot.lane.b32.xlu0 %v518_v1, %s490_s13  ;;  %v532_v3 = vld [vmem:[%s1182_s1 + $0x8] sm:$0xff]  ;;  %v546_v5 = vld [vmem:[%s1182_s1 + $0x20] sm:$0xff] }
   0x3   :  { %v541_v4 = vld [vmem:[%s1182_s1 + $0x28] sm:$0xff]  ;;  %v556_v7 = vld [vmem:[%s1183_s0] sm:$0xff]  ;;  %v561_v8 = vld [vmem:[%s1183_s0 + $0x18] sm:$0xff] }
   0x4   :  { %v551_v6 = vld [vmem:[%s1183_s0 + $0x8] sm:$0xff]  ;;  %28 = vst.msk [vmem:[%s1184_s2] sm:$0xff] %vm27_vm0, %v556_v7  ;;  %31 = vst.msk [vmem:[%s1184_s2 + $0x18] sm:$0xff] %vm27_vm0, %v561_v8  ;;  %v581_v9 = vld [vmem:[%s1183_s0 + $0x10] sm:$0xff] }
   0x5   :  { %29 = vst.msk [vmem:[%s1184_s2 + $0x8] sm:$0xff] %vm27_vm0, %v551_v6  ;;  %v586_v10 = vld [vmem:[%s1183_s0 + $0x28] sm:$0xff]  ;;  %v591_v11 = vld [vmem:[%s1183_s0 + $0x20] sm:$0xff]  ;;  %v596_v12 = vld [vmem:[%s1182_s1 + $0x38] sm:$0xff] }
   0x6   :  { %82 = vrot.lane.b32.xlu1 %v527_v2, %s490_s13  ;;  %78 = vrot.lane.b32.xlu0 %v532_v3, %s490_s13  ;;  %v601_v13 = vld [vmem:[%s1182_s1 + $0x30] sm:$0xff]  ;;  %30 = vst.msk [vmem:[%s1184_s2 + $0x10] sm:$0xff] %vm27_vm0, %v581_v9 }
   0x7   :  { %33 = vst.msk [vmem:[%s1184_s2 + $0x28] sm:$0xff] %vm27_vm0, %v586_v10  ;;  %32 = vst.msk [vmem:[%s1184_s2 + $0x20] sm:$0xff] %vm27_vm0, %v591_v11  ;;  %v621_v14 = vld [vmem:[%s1183_s0 + $0x38] sm:$0xff]  ;;  %v626_v15 = vld [vmem:[%s1183_s0 + $0x30] sm:$0xff] }
   0x8   :  { %v631_v16 = vld [vmem:[%s1183_s0 + $0x48] sm:$0xff]  ;;  %35 = vst.msk [vmem:[%s1184_s2 + $0x38] sm:$0xff] %vm27_vm0, %v621_v14  ;;  %34 = vst.msk [vmem:[%s1184_s2 + $0x30] sm:$0xff] %vm27_vm0, %v626_v15  ;;  %v655_v17 = vld [vmem:[%s1183_s0 + $0x40] sm:$0xff] }
   0x9   :  { %37 = vst.msk [vmem:[%s1184_s2 + $0x48] sm:$0xff] %vm27_vm0, %v631_v16  ;;  %v660_v18 = vld [vmem:[%s1183_s0 + $0x58] sm:$0xff]  ;;  %36 = vst.msk [vmem:[%s1184_s2 + $0x40] sm:$0xff] %vm27_vm0, %v655_v17  ;;  %v675_v19 = vld [vmem:[%s1183_s0 + $0x50] sm:$0xff] }
   0xa   :  { %86 = vrot.lane.b32.xlu1 %v541_v4, %s490_s13  ;;  %84 = vrot.lane.b32.xlu0 %v546_v5, %s490_s13  ;;  %39 = vst.msk [vmem:[%s1184_s2 + $0x58] sm:$0xff] %vm27_vm0, %v660_v18  ;;  %v680_v20 = vld [vmem:[%s1183_s0 + $0x68] sm:$0xff] }
   0xb   :  { %v685_v21 = vld [vmem:[%s1183_s0 + $0x60] sm:$0xff]  ;;  %38 = vst.msk [vmem:[%s1184_s2 + $0x50] sm:$0xff] %vm27_vm0, %v675_v19  ;;  %41 = vst.msk [vmem:[%s1184_s2 + $0x68] sm:$0xff] %vm27_vm0, %v680_v20  ;;  %v705_v22 = vld [vmem:[%s1183_s0 + $0x78] sm:$0xff] }
   0xc   :  { %40 = vst.msk [vmem:[%s1184_s2 + $0x60] sm:$0xff] %vm27_vm0, %v685_v21  ;;  %v710_v23 = vld [vmem:[%s1183_s0 + $0x70] sm:$0xff]  ;;  %43 = vst.msk [vmem:[%s1184_s2 + $0x78] sm:$0xff] %vm27_vm0, %v705_v22  ;;  %v729_v24 = vld [vmem:[%s1182_s1 + $0x48] sm:$0xff] }
   0xd   :  { %42 = vst.msk [vmem:[%s1184_s2 + $0x70] sm:$0xff] %vm27_vm0, %v710_v23  ;;  %v734_v25 = vld [vmem:[%s1182_s1 + $0x40] sm:$0xff]  ;;  %v743_v26 = vld [vmem:[%s1182_s1 + $0x58] sm:$0xff]  ;;  %v748_v27 = vld [vmem:[%s1182_s1 + $0x50] sm:$0xff] }
   0xe   :  { %90 = vrot.lane.b32.xlu1 %v596_v12, %s490_s13  ;;  %88 = vrot.lane.b32.xlu0 %v601_v13, %s490_s13  ;;  %v757_v28 = vld [vmem:[%s1182_s1 + $0x68] sm:$0xff]  ;;  %v762_v29 = vld [vmem:[%s1182_s1 + $0x60] sm:$0xff] }
   0xf   :  { %v771_v30 = vld [vmem:[%s1182_s1 + $0x78] sm:$0xff]  ;;  %v776_v31 = vld [vmem:[%s1182_s1 + $0x70] sm:$0xff]  ;;  %s492_s1 = smov 65  }
  0x12   :  { %94 = vrot.lane.b32.xlu1 %v729_v24, %s490_s13  ;;  %92 = vrot.lane.b32.xlu0 %v734_v25, %s490_s13 }
  0x16   :  { %98 = vrot.lane.b32.xlu1 %v743_v26, %s490_s13  ;;  %96 = vrot.lane.b32.xlu0 %v748_v27, %s490_s13 }
  0x1a   :  { %102 = vrot.lane.b32.xlu1 %v757_v28, %s490_s13  ;;  %100 = vrot.lane.b32.xlu0 %v762_v29, %s490_s13 }
  0x1e   :  { %106 = vrot.lane.b32.xlu1 %v771_v30, %s490_s13  ;;  %104 = vrot.lane.b32.xlu0 %v776_v31, %s490_s13  ;;  %s493_s13 = smov 68  }
  0x22   :  { %159 = vrot.lane.b32.xlu1 %v551_v6, %s491_s24  ;;  %157 = vrot.lane.b32.xlu0 %v556_v7, %s491_s24 }
  0x26   :  { %163 = vrot.lane.b32.xlu1 %v561_v8, %s491_s24  ;;  %161 = vrot.lane.b32.xlu0 %v581_v9, %s491_s24 }
  0x2a   :  { %167 = vrot.lane.b32.xlu1 %v586_v10, %s491_s24  ;;  %165 = vrot.lane.b32.xlu0 %v591_v11, %s491_s24 }
  0x2e   :  { %171 = vrot.lane.b32.xlu1 %v621_v14, %s491_s24  ;;  %169 = vrot.lane.b32.xlu0 %v626_v15, %s491_s24 }
  0x32   :  { %175 = vrot.lane.b32.xlu1 %v631_v16, %s491_s24  ;;  %173 = vrot.lane.b32.xlu0 %v655_v17, %s491_s24 }
  0x36   :  { %179 = vrot.lane.b32.xlu1 %v660_v18, %s491_s24  ;;  %177 = vrot.lane.b32.xlu0 %v675_v19, %s491_s24 }
  0x3a   :  { %183 = vrot.lane.b32.xlu1 %v680_v20, %s491_s24  ;;  %181 = vrot.lane.b32.xlu0 %v685_v21, %s491_s24 }
  0x3e   :  { %187 = vrot.lane.b32.xlu1 %v705_v22, %s491_s24  ;;  %185 = vrot.lane.b32.xlu0 %v710_v23, %s491_s24 }
  0x42   :  { %256 = vrot.lane.b32.xlu1 %v532_v3, %s492_s1  ;;  %254 = vrot.lane.b32.xlu0 %v518_v1, %s492_s1 }
  0x46   :  { %260 = vrot.lane.b32.xlu1 %v527_v2, %s492_s1  ;;  %258 = vrot.lane.b32.xlu0 %v513_v0, %s492_s1 }
  0x4a   :  { %264 = vrot.lane.b32.xlu1 %v541_v4, %s492_s1  ;;  %262 = vrot.lane.b32.xlu0 %v546_v5, %s492_s1 }
  0x4e   :  { %268 = vrot.lane.b32.xlu1 %v596_v12, %s492_s1  ;;  %266 = vrot.lane.b32.xlu0 %v601_v13, %s492_s1 }
  0x52   :  { %272 = vrot.lane.b32.xlu1 %v729_v24, %s492_s1  ;;  %270 = vrot.lane.b32.xlu0 %v734_v25, %s492_s1 }
  0x56   :  { %276 = vrot.lane.b32.xlu1 %v743_v26, %s492_s1  ;;  %274 = vrot.lane.b32.xlu0 %v748_v27, %s492_s1 }
  0x5a   :  { %280 = vrot.lane.b32.xlu1 %v757_v28, %s492_s1  ;;  %278 = vrot.lane.b32.xlu0 %v762_v29, %s492_s1 }
  0x5e   :  { %284 = vrot.lane.b32.xlu1 %v771_v30, %s492_s1  ;;  %282 = vrot.lane.b32.xlu0 %v776_v31, %s492_s1 }
  0x62   :  { %321 = vrot.lane.b32.xlu1 %v551_v6, %s493_s13  ;;  %319 = vrot.lane.b32.xlu0 %v556_v7, %s493_s13 }
  0x66   :  { %325 = vrot.lane.b32.xlu1 %v561_v8, %s493_s13  ;;  %323 = vrot.lane.b32.xlu0 %v581_v9, %s493_s13 }
  0x6a   :  { %329 = vrot.lane.b32.xlu1 %v586_v10, %s493_s13  ;;  %327 = vrot.lane.b32.xlu0 %v591_v11, %s493_s13 }
  0x6e   :  { %333 = vrot.lane.b32.xlu1 %v621_v14, %s493_s13  ;;  %331 = vrot.lane.b32.xlu0 %v626_v15, %s493_s13 }
  0x72   :  { %337 = vrot.lane.b32.xlu1 %v631_v16, %s493_s13  ;;  %335 = vrot.lane.b32.xlu0 %v655_v17, %s493_s13 }
  0x74   :  { %v81_v32 = vpop.permute.xlu1 %80  ;;  %v77_v33 = vpop.permute.xlu0 %76 }
  0x75   :  { %127 = vst.msk [vmem:[%s1184_s2 + $0x10] sm:$0xff] %vm124_vm1, %v81_v32  ;;  %125 = vst.msk [vmem:[%s1184_s2] sm:$0xff] %vm124_vm1, %v77_v33 }
  0x76   :  { %341 = vrot.lane.b32.xlu1 %v660_v18, %s493_s13  ;;  %339 = vrot.lane.b32.xlu0 %v675_v19, %s493_s13 }
  0x78   :  { %v83_v34 = vpop.permute.xlu1 %82  ;;  %v79_v35 = vpop.permute.xlu0 %78 }
  0x79   :  { %128 = vst.msk [vmem:[%s1184_s2 + $0x18] sm:$0xff] %vm124_vm1, %v83_v34  ;;  %126 = vst.msk [vmem:[%s1184_s2 + $0x8] sm:$0xff] %vm124_vm1, %v79_v35 }
  0x7a   :  { %345 = vrot.lane.b32.xlu1 %v680_v20, %s493_s13  ;;  %343 = vrot.lane.b32.xlu0 %v685_v21, %s493_s13 }
  0x7c   :  { %v87_v36 = vpop.permute.xlu1 %86  ;;  %v85_v37 = vpop.permute.xlu0 %84 }
  0x7d   :  { %130 = vst.msk [vmem:[%s1184_s2 + $0x28] sm:$0xff] %vm124_vm1, %v87_v36  ;;  %129 = vst.msk [vmem:[%s1184_s2 + $0x20] sm:$0xff] %vm124_vm1, %v85_v37 }
  0x7e   :  { %349 = vrot.lane.b32.xlu1 %v705_v22, %s493_s13  ;;  %347 = vrot.lane.b32.xlu0 %v710_v23, %s493_s13 }
  0x80   :  { %v91_v38 = vpop.permute.xlu1 %90  ;;  %v89_v39 = vpop.permute.xlu0 %88 }
  0x81   :  { %132 = vst.msk [vmem:[%s1184_s2 + $0x38] sm:$0xff] %vm124_vm1, %v91_v38  ;;  %131 = vst.msk [vmem:[%s1184_s2 + $0x30] sm:$0xff] %vm124_vm1, %v89_v39 }
  0x82   :  { %418 = vrot.lane.b32.xlu1 %v532_v3, %s494_s12  ;;  %416 = vrot.lane.b32.xlu0 %v518_v1, %s494_s12 }
  0x84   :  { %v95_v40 = vpop.permute.xlu1 %94  ;;  %v93_v41 = vpop.permute.xlu0 %92 }
  0x85   :  { %134 = vst.msk [vmem:[%s1184_s2 + $0x48] sm:$0xff] %vm124_vm1, %v95_v40  ;;  %133 = vst.msk [vmem:[%s1184_s2 + $0x40] sm:$0xff] %vm124_vm1, %v93_v41 }
  0x86   :  { %422 = vrot.lane.b32.xlu1 %v527_v2, %s494_s12  ;;  %420 = vrot.lane.b32.xlu0 %v513_v0, %s494_s12 }
  0x88   :  { %v99_v42 = vpop.permute.xlu1 %98  ;;  %v97_v43 = vpop.permute.xlu0 %96 }
  0x89   :  { %136 = vst.msk [vmem:[%s1184_s2 + $0x58] sm:$0xff] %vm124_vm1, %v99_v42  ;;  %135 = vst.msk [vmem:[%s1184_s2 + $0x50] sm:$0xff] %vm124_vm1, %v97_v43 }
  0x8a   :  { %426 = vrot.lane.b32.xlu1 %v541_v4, %s494_s12  ;;  %424 = vrot.lane.b32.xlu0 %v546_v5, %s494_s12 }
  0x8c   :  { %v103_v44 = vpop.permute.xlu1 %102  ;;  %v101_v45 = vpop.permute.xlu0 %100 }
  0x8d   :  { %138 = vst.msk [vmem:[%s1184_s2 + $0x68] sm:$0xff] %vm124_vm1, %v103_v44  ;;  %137 = vst.msk [vmem:[%s1184_s2 + $0x60] sm:$0xff] %vm124_vm1, %v101_v45 }
  0x8e   :  { %430 = vrot.lane.b32.xlu1 %v596_v12, %s494_s12  ;;  %428 = vrot.lane.b32.xlu0 %v601_v13, %s494_s12 }
  0x90   :  { %v107_v46 = vpop.permute.xlu1 %106  ;;  %v105_v47 = vpop.permute.xlu0 %104 }
  0x91   :  { %140 = vst.msk [vmem:[%s1184_s2 + $0x78] sm:$0xff] %vm124_vm1, %v107_v46  ;;  %139 = vst.msk [vmem:[%s1184_s2 + $0x70] sm:$0xff] %vm124_vm1, %v105_v47 }
  0x92   :  { %434 = vrot.lane.b32.xlu1 %v729_v24, %s494_s12  ;;  %432 = vrot.lane.b32.xlu0 %v734_v25, %s494_s12 }
  0x94   :  { %v160_v48 = vpop.permute.xlu1 %159  ;;  %v158_v49 = vpop.permute.xlu0 %157 }
  0x95   :  { %207 = vst.msk [vmem:[%s1184_s2 + $0x8] sm:$0xff] %vm205_vm2, %v160_v48  ;;  %206 = vst.msk [vmem:[%s1184_s2] sm:$0xff] %vm205_vm2, %v158_v49 }
  0x96   :  { %438 = vrot.lane.b32.xlu1 %v743_v26, %s494_s12  ;;  %436 = vrot.lane.b32.xlu0 %v748_v27, %s494_s12 }
  0x98   :  { %v164_v50 = vpop.permute.xlu1 %163  ;;  %v162_v51 = vpop.permute.xlu0 %161 }
  0x99   :  { %209 = vst.msk [vmem:[%s1184_s2 + $0x18] sm:$0xff] %vm205_vm2, %v164_v50  ;;  %208 = vst.msk [vmem:[%s1184_s2 + $0x10] sm:$0xff] %vm205_vm2, %v162_v51 }
  0x9a   :  { %442 = vrot.lane.b32.xlu1 %v757_v28, %s494_s12  ;;  %440 = vrot.lane.b32.xlu0 %v762_v29, %s494_s12 }
  0x9c   :  { %v168_v52 = vpop.permute.xlu1 %167  ;;  %v166_v53 = vpop.permute.xlu0 %165 }
  0x9d   :  { %211 = vst.msk [vmem:[%s1184_s2 + $0x28] sm:$0xff] %vm205_vm2, %v168_v52  ;;  %210 = vst.msk [vmem:[%s1184_s2 + $0x20] sm:$0xff] %vm205_vm2, %v166_v53 }
  0x9e   :  { %446 = vrot.lane.b32.xlu1 %v771_v30, %s494_s12  ;;  %444 = vrot.lane.b32.xlu0 %v776_v31, %s494_s12 }
  0xa0   :  { %v172_v54 = vpop.permute.xlu1 %171  ;;  %v170_v55 = vpop.permute.xlu0 %169 }
  0xa1   :  { %213 = vst.msk [vmem:[%s1184_s2 + $0x38] sm:$0xff] %vm205_vm2, %v172_v54  ;;  %212 = vst.msk [vmem:[%s1184_s2 + $0x30] sm:$0xff] %vm205_vm2, %v170_v55 }
  0xa4   :  { %v176_v56 = vpop.permute.xlu1 %175  ;;  %v174_v57 = vpop.permute.xlu0 %173 }
  0xa5   :  { %215 = vst.msk [vmem:[%s1184_s2 + $0x48] sm:$0xff] %vm205_vm2, %v176_v56  ;;  %214 = vst.msk [vmem:[%s1184_s2 + $0x40] sm:$0xff] %vm205_vm2, %v174_v57 }
  0xa8   :  { %v180_v58 = vpop.permute.xlu1 %179  ;;  %v178_v59 = vpop.permute.xlu0 %177 }
  0xa9   :  { %217 = vst.msk [vmem:[%s1184_s2 + $0x58] sm:$0xff] %vm205_vm2, %v180_v58  ;;  %216 = vst.msk [vmem:[%s1184_s2 + $0x50] sm:$0xff] %vm205_vm2, %v178_v59 }
  0xac   :  { %v184_v60 = vpop.permute.xlu1 %183  ;;  %v182_v61 = vpop.permute.xlu0 %181 }
  0xad   :  { %219 = vst.msk [vmem:[%s1184_s2 + $0x68] sm:$0xff] %vm205_vm2, %v184_v60  ;;  %218 = vst.msk [vmem:[%s1184_s2 + $0x60] sm:$0xff] %vm205_vm2, %v182_v61 }
  0xb0   :  { %v188_v62 = vpop.permute.xlu1 %187  ;;  %v186_v63 = vpop.permute.xlu0 %185 }
  0xb1   :  { %221 = vst.msk [vmem:[%s1184_s2 + $0x78] sm:$0xff] %vm205_vm2, %v188_v62  ;;  %220 = vst.msk [vmem:[%s1184_s2 + $0x70] sm:$0xff] %vm205_vm2, %v186_v63 }
  0xb4   :  { %v257_v0 = vpop.permute.xlu1 %256  ;;  %v255_v1 = vpop.permute.xlu0 %254 }
  0xb5   :  { %304 = vst.msk [vmem:[%s1184_s2 + $0x8] sm:$0xff] %vm302_vm3, %v257_v0  ;;  %303 = vst.msk [vmem:[%s1184_s2] sm:$0xff] %vm302_vm3, %v255_v1 }
  0xb8   :  { %v261_v2 = vpop.permute.xlu1 %260  ;;  %v259_v3 = vpop.permute.xlu0 %258 }
  0xb9   :  { %306 = vst.msk [vmem:[%s1184_s2 + $0x18] sm:$0xff] %vm302_vm3, %v261_v2  ;;  %305 = vst.msk [vmem:[%s1184_s2 + $0x10] sm:$0xff] %vm302_vm3, %v259_v3 }
  0xbc   :  { %v265_v4 = vpop.permute.xlu1 %264  ;;  %v263_v5 = vpop.permute.xlu0 %262 }
  0xbd   :  { %308 = vst.msk [vmem:[%s1184_s2 + $0x28] sm:$0xff] %vm302_vm3, %v265_v4  ;;  %307 = vst.msk [vmem:[%s1184_s2 + $0x20] sm:$0xff] %vm302_vm3, %v263_v5 }
  0xc0   :  { %v269_v6 = vpop.permute.xlu1 %268  ;;  %v267_v7 = vpop.permute.xlu0 %266 }
  0xc1   :  { %310 = vst.msk [vmem:[%s1184_s2 + $0x38] sm:$0xff] %vm302_vm3, %v269_v6  ;;  %309 = vst.msk [vmem:[%s1184_s2 + $0x30] sm:$0xff] %vm302_vm3, %v267_v7 }
  0xc4   :  { %v273_v8 = vpop.permute.xlu1 %272  ;;  %v271_v9 = vpop.permute.xlu0 %270 }
  0xc5   :  { %312 = vst.msk [vmem:[%s1184_s2 + $0x48] sm:$0xff] %vm302_vm3, %v273_v8  ;;  %311 = vst.msk [vmem:[%s1184_s2 + $0x40] sm:$0xff] %vm302_vm3, %v271_v9 }
  0xc8   :  { %v277_v10 = vpop.permute.xlu1 %276  ;;  %v275_v11 = vpop.permute.xlu0 %274 }
  0xc9   :  { %314 = vst.msk [vmem:[%s1184_s2 + $0x58] sm:$0xff] %vm302_vm3, %v277_v10  ;;  %313 = vst.msk [vmem:[%s1184_s2 + $0x50] sm:$0xff] %vm302_vm3, %v275_v11 }
  0xcc   :  { %v281_v12 = vpop.permute.xlu1 %280  ;;  %v279_v13 = vpop.permute.xlu0 %278 }
  0xcd   :  { %316 = vst.msk [vmem:[%s1184_s2 + $0x68] sm:$0xff] %vm302_vm3, %v281_v12  ;;  %315 = vst.msk [vmem:[%s1184_s2 + $0x60] sm:$0xff] %vm302_vm3, %v279_v13 }
  0xd0   :  { %v285_v14 = vpop.permute.xlu1 %284  ;;  %v283_v15 = vpop.permute.xlu0 %282 }
  0xd1   :  { %318 = vst.msk [vmem:[%s1184_s2 + $0x78] sm:$0xff] %vm302_vm3, %v285_v14  ;;  %317 = vst.msk [vmem:[%s1184_s2 + $0x70] sm:$0xff] %vm302_vm3, %v283_v15 }
  0xd4   :  { %v322_v16 = vpop.permute.xlu1 %321  ;;  %v320_v17 = vpop.permute.xlu0 %319 }
  0xd5   :  { %369 = vst.msk [vmem:[%s1184_s2 + $0x8] sm:$0xff] %vm367_vm4, %v322_v16  ;;  %368 = vst.msk [vmem:[%s1184_s2] sm:$0xff] %vm367_vm4, %v320_v17 }
  0xd8   :  { %v326_v18 = vpop.permute.xlu1 %325  ;;  %v324_v19 = vpop.permute.xlu0 %323 }
  0xd9   :  { %371 = vst.msk [vmem:[%s1184_s2 + $0x18] sm:$0xff] %vm367_vm4, %v326_v18  ;;  %370 = vst.msk [vmem:[%s1184_s2 + $0x10] sm:$0xff] %vm367_vm4, %v324_v19 }
  0xdc   :  { %v330_v20 = vpop.permute.xlu1 %329  ;;  %v328_v21 = vpop.permute.xlu0 %327 }
  0xdd   :  { %373 = vst.msk [vmem:[%s1184_s2 + $0x28] sm:$0xff] %vm367_vm4, %v330_v20  ;;  %372 = vst.msk [vmem:[%s1184_s2 + $0x20] sm:$0xff] %vm367_vm4, %v328_v21 }
  0xe0   :  { %v334_v22 = vpop.permute.xlu1 %333  ;;  %v332_v23 = vpop.permute.xlu0 %331 }
  0xe1   :  { %375 = vst.msk [vmem:[%s1184_s2 + $0x38] sm:$0xff] %vm367_vm4, %v334_v22  ;;  %374 = vst.msk [vmem:[%s1184_s2 + $0x30] sm:$0xff] %vm367_vm4, %v332_v23 }
  0xe4   :  { %v338_v24 = vpop.permute.xlu1 %337  ;;  %v336_v25 = vpop.permute.xlu0 %335 }
  0xe5   :  { %377 = vst.msk [vmem:[%s1184_s2 + $0x48] sm:$0xff] %vm367_vm4, %v338_v24  ;;  %376 = vst.msk [vmem:[%s1184_s2 + $0x40] sm:$0xff] %vm367_vm4, %v336_v25 }
  0xe8   :  { %v342_v26 = vpop.permute.xlu1 %341  ;;  %v340_v27 = vpop.permute.xlu0 %339 }
  0xe9   :  { %379 = vst.msk [vmem:[%s1184_s2 + $0x58] sm:$0xff] %vm367_vm4, %v342_v26  ;;  %378 = vst.msk [vmem:[%s1184_s2 + $0x50] sm:$0xff] %vm367_vm4, %v340_v27 }
  0xec   :  { %v346_v28 = vpop.permute.xlu1 %345  ;;  %v344_v29 = vpop.permute.xlu0 %343 }
  0xed   :  { %381 = vst.msk [vmem:[%s1184_s2 + $0x68] sm:$0xff] %vm367_vm4, %v346_v28  ;;  %380 = vst.msk [vmem:[%s1184_s2 + $0x60] sm:$0xff] %vm367_vm4, %v344_v29 }
  0xf0   :  { %v350_v30 = vpop.permute.xlu1 %349  ;;  %v348_v31 = vpop.permute.xlu0 %347 }
  0xf1   :  { %383 = vst.msk [vmem:[%s1184_s2 + $0x78] sm:$0xff] %vm367_vm4, %v350_v30  ;;  %382 = vst.msk [vmem:[%s1184_s2 + $0x70] sm:$0xff] %vm367_vm4, %v348_v31 }
  0xf4   :  { %v419_v32 = vpop.permute.xlu1 %418  ;;  %v417_v33 = vpop.permute.xlu0 %416 }
  0xf5   :  { %466 = vst.msk [vmem:[%s1184_s2 + $0x8] sm:$0xff] %vm464_vm5, %v419_v32  ;;  %465 = vst.msk [vmem:[%s1184_s2] sm:$0xff] %vm464_vm5, %v417_v33 }
  0xf8   :  { %v423_v34 = vpop.permute.xlu1 %422  ;;  %v421_v35 = vpop.permute.xlu0 %420 }
  0xf9   :  { %468 = vst.msk [vmem:[%s1184_s2 + $0x18] sm:$0xff] %vm464_vm5, %v423_v34  ;;  %467 = vst.msk [vmem:[%s1184_s2 + $0x10] sm:$0xff] %vm464_vm5, %v421_v35 }
  0xfc   :  { %v427_v36 = vpop.permute.xlu1 %426  ;;  %v425_v37 = vpop.permute.xlu0 %424 }
  0xfd   :  { %470 = vst.msk [vmem:[%s1184_s2 + $0x28] sm:$0xff] %vm464_vm5, %v427_v36  ;;  %469 = vst.msk [vmem:[%s1184_s2 + $0x20] sm:$0xff] %vm464_vm5, %v425_v37 }
 0x100   :  { %v431_v38 = vpop.permute.xlu1 %430  ;;  %v429_v39 = vpop.permute.xlu0 %428 }
 0x101   :  { %472 = vst.msk [vmem:[%s1184_s2 + $0x38] sm:$0xff] %vm464_vm5, %v431_v38  ;;  %471 = vst.msk [vmem:[%s1184_s2 + $0x30] sm:$0xff] %vm464_vm5, %v429_v39 }
 0x104   :  { %v435_v40 = vpop.permute.xlu1 %434  ;;  %v433_v41 = vpop.permute.xlu0 %432 }
 0x105   :  { %474 = vst.msk [vmem:[%s1184_s2 + $0x48] sm:$0xff] %vm464_vm5, %v435_v40  ;;  %473 = vst.msk [vmem:[%s1184_s2 + $0x40] sm:$0xff] %vm464_vm5, %v433_v41 }
 0x108   :  { %v439_v42 = vpop.permute.xlu1 %438  ;;  %v437_v43 = vpop.permute.xlu0 %436 }
 0x109   :  { %476 = vst.msk [vmem:[%s1184_s2 + $0x58] sm:$0xff] %vm464_vm5, %v439_v42  ;;  %475 = vst.msk [vmem:[%s1184_s2 + $0x50] sm:$0xff] %vm464_vm5, %v437_v43 }
 0x10c   :  { %v443_v44 = vpop.permute.xlu1 %442  ;;  %v441_v45 = vpop.permute.xlu0 %440 }
 0x10d   :  { %478 = vst.msk [vmem:[%s1184_s2 + $0x68] sm:$0xff] %vm464_vm5, %v443_v44  ;;  %477 = vst.msk [vmem:[%s1184_s2 + $0x60] sm:$0xff] %vm464_vm5, %v441_v45 }
 0x110   :  { %v447_v46 = vpop.permute.xlu1 %446  ;;  %v445_v47 = vpop.permute.xlu0 %444 }
 0x111   :  { %480 = vst.msk [vmem:[%s1184_s2 + $0x78] sm:$0xff] %vm464_vm5, %v447_v46  ;;  %479 = vst.msk [vmem:[%s1184_s2 + $0x70] sm:$0xff] %vm464_vm5, %v445_v47 }

</bundles_post_ra>
